<compile_context>
chip_gen: v5e
topology: v5e:2x2
jax: 0.10.0
libtpu: 0.0.40
codegen_flags: <defaults>
</compile_context>

<pallas_src>
import jax
import jax.numpy as jnp
from jax.experimental import pallas as pl
from jax.experimental.pallas import tpu as pltpu

COEFF_ENERGY = 0.5
COEFF_LATENCY = 0.5

_IN_FEATURES = 10 * 12      # 120 (flattened input)
_PAD_K = 128                # padded feature width (lane multiple)


# ---------------------------------------------------------------------------
# Pallas kernel: whole MLP + head, fused, batched
# ---------------------------------------------------------------------------
def _softplus(x):
    # numerically stable log(1 + exp(x))
    return jnp.maximum(x, 0.0) + jnp.log(1.0 + jnp.exp(-jnp.abs(x)))


def _sigmoid(x):
    # EUP exp + approx reciprocal (keeps the divide off the VALU path)
    return pl.reciprocal(1.0 + jnp.exp(-x), approx=True)


def _mlp_kernel(x_ref, w_ref, misc_ref, out_ref):
    # x_ref   : [TM, 128] f32   candidate rows (zero-padded lanes 120..127)
    # w_ref   : [3, 128, 128] bf16  (w1, w2, w3 zero-padded)
    # misc_ref: [8, 128] f32
    #   row 0: b1            row 1: b2         row 2: b3 (zero beyond lane 63)
    #   row 3: w4[:,0] in lanes 0..63, b4[0] in lane 127
    #   row 4: w4[:,1] in lanes 0..63, b4[1] in lane 127
    x = x_ref[...].astype(jnp.bfloat16)
    h = jnp.dot(x, w_ref[0], preferred_element_type=jnp.float32) + misc_ref[0:1, :]
    h = _softplus(h)
    h = jnp.dot(h.astype(jnp.bfloat16), w_ref[1],
                preferred_element_type=jnp.float32) + misc_ref[1:2, :]
    h = _softplus(h)
    h = jnp.dot(h.astype(jnp.bfloat16), w_ref[2],
                preferred_element_type=jnp.float32) + misc_ref[2:3, :]
    h = h - jnp.tanh(h)                              # Tanhshrink; padded lanes stay exactly 0

    # Constant-1 lane so the head rows' lane-127 entries act as b4.
    lane = jax.lax.broadcasted_iota(jnp.int32, h.shape, dimension=1)
    h = jnp.where(lane == (_PAD_K - 1), 1.0, h)

    s0 = jnp.sum(h * misc_ref[3:4, :], axis=-1, keepdims=True)   # [TM, 1]
    s1 = jnp.sum(h * misc_ref[4:5, :], axis=-1, keepdims=True)   # [TM, 1]
    y0 = _sigmoid(s0)
    y1 = _sigmoid(s1)
    out_ref[...] = COEFF_ENERGY * y0 + COEFF_LATENCY * y1


# ---------------------------------------------------------------------------
# Deterministic parameter construction (PyTorch-Linear-style init, pre-packed)
# ---------------------------------------------------------------------------
def _linear(key, fan_in, fan_out):
    kw, kb = jax.random.split(key)
    bound = 1.0 / float(fan_in) ** 0.5
    w = jax.random.uniform(kw, (fan_in, fan_out), jnp.float32, -bound, bound)
    b = jax.random.uniform(kb, (fan_out,), jnp.float32, -bound, bound)
    return w, b


def init_params(key):
    k1, k2, k3, k4 = jax.random.split(key, 4)
    w1, b1 = _linear(k1, _IN_FEATURES, 128)   # Linear(120, 128)
    w2, b2 = _linear(k2, 128, 128)            # Linear(128, 128)
    w3, b3 = _linear(k3, 128, 64)             # Linear(128, 64)
    w4, b4 = _linear(k4, 64, 2)               # Linear(64, 2)

    # One contiguous bf16 weight stack (w1, w2, w3 padded to 128x128).
    wstack = jnp.zeros((3, _PAD_K, _PAD_K), jnp.float32)
    wstack = wstack.at[0, :_IN_FEATURES, :].set(w1)
    wstack = wstack.at[1].set(w2)
    wstack = wstack.at[2, :, :64].set(w3)
    wstack = wstack.astype(jnp.bfloat16)

    # One (8,128) f32 tile with biases + the 2-column head.
    misc = jnp.zeros((8, _PAD_K), jnp.float32)
    misc = misc.at[0].set(b1)
    misc = misc.at[1].set(b2)
    misc = misc.at[2, :64].set(b3)
    misc = misc.at[3, :64].set(w4[:, 0])
    misc = misc.at[3, _PAD_K - 1].set(b4[0])
    misc = misc.at[4, :64].set(w4[:, 1])
    misc = misc.at[4, _PAD_K - 1].set(b4[1])

    return {"wstack": wstack, "misc": misc,
            "raw": ((w1, b1), (w2, b2), (w3, b3), (w4, b4))}


# ---------------------------------------------------------------------------
# Forward passes (one kernel dispatch per batch of candidates)
# ---------------------------------------------------------------------------
def forward_batch(params, xs, *, tm=128):
    """Score B candidates in one pallas_call.  xs: [B, 10, 12] (or [B, 120])."""
    xs = jnp.asarray(xs, jnp.float32)
    B = xs.shape[0]
    xf = xs.reshape(B, -1)                              # [B, 120]

    rows8 = -(-B // 8) * 8                              # sublane-align
    tm_eff = rows8 if rows8 <= tm else tm               # tile rows
    b_pad = -(-B // tm_eff) * tm_eff
    grid = (b_pad // tm_eff,)

    xp = jnp.pad(xf, ((0, b_pad - B), (0, _PAD_K - _IN_FEATURES)))
    wstack, misc = params["wstack"], params["misc"]

    flops = 2 * b_pad * _PAD_K * _PAD_K * 3 + 4 * b_pad * _PAD_K
    transcendentals = 3 * b_pad * _PAD_K + 2 * b_pad
    bytes_accessed = xp.size * 4 + wstack.size * 2 + misc.size * 4 + b_pad * 4

    out = pl.pallas_call(
        _mlp_kernel,
        out_shape=jax.ShapeDtypeStruct((b_pad, 1), jnp.float32),
        grid=grid,
        in_specs=[
            pl.BlockSpec((tm_eff, _PAD_K), lambda i: (i, 0)),          # candidate rows
            pl.BlockSpec((3, _PAD_K, _PAD_K), lambda i: (0, 0, 0)),    # weights, VMEM-resident
            pl.BlockSpec((8, _PAD_K), lambda i: (0, 0)),               # biases + head, resident
        ],
        out_specs=pl.BlockSpec((tm_eff, 1), lambda i: (i, 0)),
        cost_estimate=pl.CostEstimate(flops=flops,
                                      transcendentals=transcendentals,
                                      bytes_accessed=bytes_accessed),
        compiler_params=pltpu.CompilerParams(
            dimension_semantics=("parallel",),
            vmem_limit_bytes=4 * 1024 * 1024),
    )(xp, wstack, misc)
    return out[:B, 0]


def forward(params, x):
    """Original module semantics: single flattened input -> scalar score."""
    return forward_batch(params, jnp.reshape(jnp.asarray(x, jnp.float32), (1, -1)))[0]


# ---------------------------------------------------------------------------
# Pure-JAX reference for validation (weights rounded to bf16 like the kernel)
# ---------------------------------------------------------------------------
def _bf16_round(w):
    return w.astype(jnp.bfloat16).astype(jnp.float32)


def _reference(params, x):
    (w1, b1), (w2, b2), (w3, b3), (w4, b4) = params["raw"]
    xf = jnp.ravel(x).astype(jnp.float32)
    h = xf @ _bf16_round(w1) + b1
    h = jax.nn.softplus(h)
    h = h @ _bf16_round(w2) + b2
    h = jax.nn.softplus(h)
    h = h @ _bf16_round(w3) + b3
    h = h - jnp.tanh(h)
    y = h @ w4 + b4
    y = jax.nn.sigmoid(y)
    return COEFF_ENERGY * y[0] + COEFF_LATENCY * y[1]


if __name__ == "__main__":
    key = jax.random.PRNGKey(0)
    pkey, xkey = jax.random.split(key)
    params = init_params(pkey)

    # Batched candidates (BaGTI inner-loop style): 16 candidates of shape (10, 12).
    xs = jax.random.normal(xkey, (16, 10, 12), jnp.float32)

    ys = jax.jit(forward_batch)(params, xs)
    jax.block_until_ready(ys)
    assert ys.shape == (16,) and bool(jnp.all(jnp.isfinite(ys)))

    # Exercise the multi-step grid path with VMEM-resident weights (tm=8 -> grid=(2,)).
    ys_grid = jax.jit(forward_batch, static_argnames=("tm",))(params, xs, tm=8)
    jax.block_until_ready(ys_grid)

    # Scalar path (original module semantics).
    y0 = jax.jit(forward)(params, xs[0])
    jax.block_until_ready(y0)

    y_ref = jax.vmap(lambda x: _reference(params, x))(xs)
    assert jnp.allclose(ys, y_ref, rtol=1e-2, atol=1e-2), (ys, y_ref)
    assert jnp.allclose(ys_grid, y_ref, rtol=1e-2, atol=1e-2), (ys_grid, y_ref)
    assert jnp.allclose(y0, y_ref[0], rtol=1e-2, atol=1e-2), (float(y0), float(y_ref[0]))
    print("KERNEL_OK")
</pallas_src>

<mosaic_0001>
module attributes {stable_mosaic.version = 11 : i64} {
  func.func @_mlp_kernel(%arg0: i32, %arg1: memref<16x128xf32, #tpu.memory_space<vmem>>, %arg2: memref<3x128x128xbf16, #tpu.memory_space<vmem>>, %arg3: memref<8x128xf32, #tpu.memory_space<vmem>>, %arg4: memref<16x1xf32, #tpu.memory_space<vmem>>) attributes {dimension_semantics = [#tpu.dimension_semantics<parallel>], iteration_bounds = array<i64: 1>, scalar_prefetch = 0 : i64, scratch_operands = 0 : i64, tpu.core_type = #tpu.core_type<tc>, window_params = [{transform_indices = @transform_0, window_bounds = array<i64: 16, 128>}, {pipeline_mode = #tpu.pipeline_mode<synchronous>, transform_indices = @transform_1, window_bounds = array<i64: 3, 128, 128>}, {pipeline_mode = #tpu.pipeline_mode<synchronous>, transform_indices = @transform_2, window_bounds = array<i64: 8, 128>}, {transform_indices = @transform_3, window_bounds = array<i64: 16, 1>}]} {
    %c0 = arith.constant 0 : index
    %c0_0 = arith.constant 0 : index
    %0 = vector.load %arg1[%c0, %c0_0] : memref<16x128xf32, #tpu.memory_space<vmem>>, vector<16x128xf32>
    %1 = arith.truncf %0 : vector<16x128xf32> to vector<16x128xbf16>
    %c0_1 = arith.constant 0 : index
    %c0_2 = arith.constant 0 : index
    %c0_3 = arith.constant 0 : index
    %2 = vector.load %arg2[%c0_1, %c0_2, %c0_3] : memref<3x128x128xbf16, #tpu.memory_space<vmem>>, vector<1x128x128xbf16>
    %3 = vector.shape_cast %2 : vector<1x128x128xbf16> to vector<128x128xbf16>
    %cst = arith.constant dense<0.000000e+00> : vector<16x128xf32>
    %4 = tpu.matmul %1, %3, %cst {dimension_numbers = #tpu.dot_dimension_numbers<[1], [0], [0], [1], [0, 0, 1, 1], [], []>} : vector<16x128xbf16>, vector<128x128xbf16>, vector<16x128xf32> -> vector<16x128xf32>
    %c0_4 = arith.constant 0 : index
    %c0_5 = arith.constant 0 : index
    %5 = vector.load %arg3[%c0_4, %c0_5] : memref<8x128xf32, #tpu.memory_space<vmem>>, vector<1x128xf32>
    %6 = vector.broadcast %5 : vector<1x128xf32> to vector<16x128xf32>
    %7 = arith.addf %4, %6 : vector<16x128xf32>
    %cst_6 = arith.constant 0.000000e+00 : f32
    %8 = vector.broadcast %cst_6 : f32 to vector<16x128xf32>
    %9 = arith.maximumf %7, %8 : vector<16x128xf32>
    %10 = math.absf %7 : vector<16x128xf32>
    %cst_7 = arith.constant 0.000000e+00 : f32
    %11 = vector.broadcast %cst_7 : f32 to vector<16x128xf32>
    %12 = arith.subf %11, %10 : vector<16x128xf32>
    %13 = math.exp %12 : vector<16x128xf32>
    %cst_8 = arith.constant 1.000000e+00 : f32
    %14 = vector.broadcast %cst_8 : f32 to vector<16x128xf32>
    %15 = arith.addf %14, %13 : vector<16x128xf32>
    %16 = math.log %15 : vector<16x128xf32>
    %17 = arith.addf %9, %16 : vector<16x128xf32>
    %18 = arith.truncf %17 : vector<16x128xf32> to vector<16x128xbf16>
    %c1 = arith.constant 1 : index
    %c0_9 = arith.constant 0 : index
    %c0_10 = arith.constant 0 : index
    %19 = vector.load %arg2[%c1, %c0_9, %c0_10] : memref<3x128x128xbf16, #tpu.memory_space<vmem>>, vector<1x128x128xbf16>
    %20 = vector.shape_cast %19 : vector<1x128x128xbf16> to vector<128x128xbf16>
    %cst_11 = arith.constant dense<0.000000e+00> : vector<16x128xf32>
    %21 = tpu.matmul %18, %20, %cst_11 {dimension_numbers = #tpu.dot_dimension_numbers<[1], [0], [0], [1], [0, 0, 1, 1], [], []>} : vector<16x128xbf16>, vector<128x128xbf16>, vector<16x128xf32> -> vector<16x128xf32>
    %c1_12 = arith.constant 1 : index
    %c0_13 = arith.constant 0 : index
    %22 = vector.load %arg3[%c1_12, %c0_13] : memref<8x128xf32, #tpu.memory_space<vmem>>, vector<1x128xf32>
    %23 = vector.broadcast %22 : vector<1x128xf32> to vector<16x128xf32>
    %24 = arith.addf %21, %23 : vector<16x128xf32>
    %cst_14 = arith.constant 0.000000e+00 : f32
    %25 = vector.broadcast %cst_14 : f32 to vector<16x128xf32>
    %26 = arith.maximumf %24, %25 : vector<16x128xf32>
    %27 = math.absf %24 : vector<16x128xf32>
    %cst_15 = arith.constant 0.000000e+00 : f32
    %28 = vector.broadcast %cst_15 : f32 to vector<16x128xf32>
    %29 = arith.subf %28, %27 : vector<16x128xf32>
    %30 = math.exp %29 : vector<16x128xf32>
    %cst_16 = arith.constant 1.000000e+00 : f32
    %31 = vector.broadcast %cst_16 : f32 to vector<16x128xf32>
    %32 = arith.addf %31, %30 : vector<16x128xf32>
    %33 = math.log %32 : vector<16x128xf32>
    %34 = arith.addf %26, %33 : vector<16x128xf32>
    %35 = arith.truncf %34 : vector<16x128xf32> to vector<16x128xbf16>
    %c2 = arith.constant 2 : index
    %c0_17 = arith.constant 0 : index
    %c0_18 = arith.constant 0 : index
    %36 = vector.load %arg2[%c2, %c0_17, %c0_18] : memref<3x128x128xbf16, #tpu.memory_space<vmem>>, vector<1x128x128xbf16>
    %37 = vector.shape_cast %36 : vector<1x128x128xbf16> to vector<128x128xbf16>
    %cst_19 = arith.constant dense<0.000000e+00> : vector<16x128xf32>
    %38 = tpu.matmul %35, %37, %cst_19 {dimension_numbers = #tpu.dot_dimension_numbers<[1], [0], [0], [1], [0, 0, 1, 1], [], []>} : vector<16x128xbf16>, vector<128x128xbf16>, vector<16x128xf32> -> vector<16x128xf32>
    %c2_20 = arith.constant 2 : index
    %c0_21 = arith.constant 0 : index
    %39 = vector.load %arg3[%c2_20, %c0_21] : memref<8x128xf32, #tpu.memory_space<vmem>>, vector<1x128xf32>
    %40 = vector.broadcast %39 : vector<1x128xf32> to vector<16x128xf32>
    %41 = arith.addf %38, %40 : vector<16x128xf32>
    %42 = math.tanh %41 : vector<16x128xf32>
    %43 = arith.subf %41, %42 : vector<16x128xf32>
    %44 = tpu.iota {dimensions = array<i32: 1>} : vector<16x128xi32>
    %c127_i32 = arith.constant 127 : i32
    %45 = vector.broadcast %c127_i32 : i32 to vector<16x128xi32>
    %46 = arith.cmpi eq, %44, %45 : vector<16x128xi32>
    %cst_22 = arith.constant 1.000000e+00 : f32
    %47 = vector.broadcast %cst_22 : f32 to vector<16x128xf32>
    %48 = arith.select %46, %47, %43 : vector<16x128xi1>, vector<16x128xf32>
    %c3 = arith.constant 3 : index
    %c0_23 = arith.constant 0 : index
    %49 = vector.load %arg3[%c3, %c0_23] : memref<8x128xf32, #tpu.memory_space<vmem>>, vector<1x128xf32>
    %50 = vector.broadcast %49 : vector<1x128xf32> to vector<16x128xf32>
    %51 = arith.mulf %48, %50 : vector<16x128xf32>
    %cst_24 = arith.constant dense<0.000000e+00> : vector<16xf32>
    %52 = vector.multi_reduction <add>, %51, %cst_24 [1] : vector<16x128xf32> to vector<16xf32>
    %53 = vector.shape_cast %52 : vector<16xf32> to vector<16x1xf32>
    %c4 = arith.constant 4 : index
    %c0_25 = arith.constant 0 : index
    %54 = vector.load %arg3[%c4, %c0_25] : memref<8x128xf32, #tpu.memory_space<vmem>>, vector<1x128xf32>
    %55 = vector.broadcast %54 : vector<1x128xf32> to vector<16x128xf32>
    %56 = arith.mulf %48, %55 : vector<16x128xf32>
    %cst_26 = arith.constant dense<0.000000e+00> : vector<16xf32>
    %57 = vector.multi_reduction <add>, %56, %cst_26 [1] : vector<16x128xf32> to vector<16xf32>
    %58 = vector.shape_cast %57 : vector<16xf32> to vector<16x1xf32>
    %cst_27 = arith.constant 0.000000e+00 : f32
    %59 = vector.broadcast %cst_27 : f32 to vector<16x1xf32>
    %60 = arith.subf %59, %53 : vector<16x1xf32>
    %61 = math.exp %60 : vector<16x1xf32>
    %cst_28 = arith.constant 1.000000e+00 : f32
    %62 = vector.broadcast %cst_28 : f32 to vector<16x1xf32>
    %63 = arith.addf %62, %61 : vector<16x1xf32>
    %64 = tpu.reciprocal %63 {approx = true} : vector<16x1xf32> -> vector<16x1xf32>
    %cst_29 = arith.constant 0.000000e+00 : f32
    %65 = vector.broadcast %cst_29 : f32 to vector<16x1xf32>
    %66 = arith.subf %65, %58 : vector<16x1xf32>
    %67 = math.exp %66 : vector<16x1xf32>
    %cst_30 = arith.constant 1.000000e+00 : f32
    %68 = vector.broadcast %cst_30 : f32 to vector<16x1xf32>
    %69 = arith.addf %68, %67 : vector<16x1xf32>
    %70 = tpu.reciprocal %69 {approx = true} : vector<16x1xf32> -> vector<16x1xf32>
    %cst_31 = arith.constant 5.000000e-01 : f32
    %71 = vector.broadcast %cst_31 : f32 to vector<16x1xf32>
    %72 = arith.mulf %71, %64 : vector<16x1xf32>
    %cst_32 = arith.constant 5.000000e-01 : f32
    %73 = vector.broadcast %cst_32 : f32 to vector<16x1xf32>
    %74 = arith.mulf %73, %70 : vector<16x1xf32>
    %75 = arith.addf %72, %74 : vector<16x1xf32>
    %c0_33 = arith.constant 0 : index
    %c0_34 = arith.constant 0 : index
    %76 = vector.load %arg4[%c0_33, %c0_34] : memref<16x1xf32, #tpu.memory_space<vmem>>, vector<16x1xf32>
    tpu.vector_store %arg4[%c0_33, %c0_34], %75 {strides = array<i32>} : memref<16x1xf32, #tpu.memory_space<vmem>>, vector<16x1xf32>,
    return
  }
  func.func @transform_0(%arg0: i32) -> (i32, i32) {
    %c0_i32 = arith.constant 0 : i32
    %c0_i32_0 = arith.constant 0 : i32
    return %arg0, %c0_i32 : i32, i32
  }
  func.func @transform_1(%arg0: i32) -> (i32, i32, i32) {
    %c0_i32 = arith.constant 0 : i32
    %c0_i32_0 = arith.constant 0 : i32
    %c0_i32_1 = arith.constant 0 : i32
    %c0_i32_2 = arith.constant 0 : i32
    return %c0_i32, %c0_i32_0, %c0_i32_1 : i32, i32, i32
  }
  func.func @transform_2(%arg0: i32) -> (i32, i32) {
    %c0_i32 = arith.constant 0 : i32
    %c0_i32_0 = arith.constant 0 : i32
    %c0_i32_1 = arith.constant 0 : i32
    return %c0_i32, %c0_i32_0 : i32, i32
  }
  func.func @transform_3(%arg0: i32) -> (i32, i32) {
    %c0_i32 = arith.constant 0 : i32
    %c0_i32_0 = arith.constant 0 : i32
    return %arg0, %c0_i32 : i32, i32
  }
}

</mosaic_0001>

<bundles_post_ra>
// kernel: forward_batch.1
= control target key start
LH: loop header
LB: loop body
LE: loop exit
PB: predicated region body
PF: predicated region fallthrough
CT: control target
= control target key end

     0   :  { %vm348_vm1 = vcmask 7168   ;;  %s667_s1 = inlined_call_operand.vmem [shape: bf16[3,128,128], index: 1, kind: input, shape index: {}]   ;;  %s668_s2 = inlined_call_operand.vmem [shape: f32[8,128], index: 2, kind: input, shape index: {}]   ;;  %s669_s0 = inlined_call_operand.vmem [shape: f32[16,128], index: 0, kind: input, shape index: {}]   ;;  %s670_s3 = inlined_call_operand.vmem [shape: f32[16,1], index: 3, kind: output, shape index: {}]  }
   0x1   :  { %v490_v0 = vld [vmem:[%s667_s1 + $0x38] sm:$0xff]  ;;  %v489_v1 = vld [vmem:[%s667_s1 + $0x30] sm:$0xff]  ;;  %v488_v2 = vld [vmem:[%s667_s1 + $0x28] sm:$0xff] }
   0x2   :  { %83 = vmatpush.bf16.msra.mxu0 %v490_v0  ;;  %v487_v3 = vld [vmem:[%s667_s1 + $0x20] sm:$0xff]  ;;  %v486_v4 = vld [vmem:[%s667_s1 + $0x18] sm:$0xff]  ;;  %v485_v5 = vld [vmem:[%s667_s1 + $0x10] sm:$0xff] }
   0x3   :  { %v484_v6 = vld [vmem:[%s667_s1 + $0x8] sm:$0xff]  ;;  %v483_v7 = vld [vmem:[%s667_s1] sm:$0xff]  ;;  %v498_v11 = vld [vmem:[%s667_s1 + $0x78] sm:$0xff] }
   0x4   :  { %v14_v8 = vld [vmem:[%s669_s0] sm:$0xff]  ;;  %v15_v9 = vld [vmem:[%s669_s0 + $0x8] sm:$0xff]  ;;  %183 = vmatpush.bf16.msra.mxu1 %v498_v11  ;;  %v497_v12 = vld [vmem:[%s667_s1 + $0x70] sm:$0xff] }
   0x5   :  { %v16_v10 = vpack.c.bf16 %v15_v9, %v14_v8  ;;  %v496_v13 = vld [vmem:[%s667_s1 + $0x68] sm:$0xff]  ;;  %v495_v14 = vld [vmem:[%s667_s1 + $0x60] sm:$0xff]  ;;  %v494_v15 = vld [vmem:[%s667_s1 + $0x58] sm:$0xff] }
   0x6   :  { %84 = vmatpush.bf16.msra.mxu0 %v489_v1  ;;  %v493_v16 = vld [vmem:[%s667_s1 + $0x50] sm:$0xff]  ;;  %v492_v17 = vld [vmem:[%s667_s1 + $0x48] sm:$0xff]  ;;  %v507_v18 = vld [vmem:[%s668_s2] ss:$0 sm:$0xff] }
   0x7   :  { %v491_v20 = vld [vmem:[%s667_s1 + $0x40] sm:$0xff]  ;;  %v506_v43 = vld [vmem:[%s667_s1 + $0xb8] sm:$0xff]  ;;  %v505_v44 = vld [vmem:[%s667_s1 + $0xb0] sm:$0xff] }
   0x8   :  { %184 = vmatpush.bf16.msra.mxu1 %v497_v12  ;;  %283 = vmatpush.bf16.msra.mxu2 %v506_v43  ;;  %v504_v45 = vld [vmem:[%s667_s1 + $0xa8] sm:$0xff]  ;;  %v503_v46 = vld [vmem:[%s667_s1 + $0xa0] sm:$0xff]  ;;  %v502_v47 = vld [vmem:[%s667_s1 + $0x98] sm:$0xff] }
   0x9   :  { %v501_v48 = vld [vmem:[%s667_s1 + $0x90] sm:$0xff]  ;;  %v500_v49 = vld [vmem:[%s667_s1 + $0x88] sm:$0xff]  ;;  %v508_v50 = vld [vmem:[%s668_s2 + $0x1] ss:$0 sm:$0xff] }
   0xa   :  { %85 = vmatpush.bf16.msra.mxu0 %v488_v2  ;;  %v499_v52 = vld [vmem:[%s667_s1 + $0x80] sm:$0xff] }
   0xb   :  { %v509_v11 = vld [vmem:[%s668_s2 + $0x2] ss:$0 sm:$0xff] }
   0xc   :  { %185 = vmatpush.bf16.msra.mxu1 %v496_v13  ;;  %284 = vmatpush.bf16.msra.mxu2 %v505_v44 }
   0xe   :  { %86 = vmatpush.bf16.msra.mxu0 %v487_v3 }
  0x10   :  { %186 = vmatpush.bf16.msra.mxu1 %v495_v14  ;;  %285 = vmatpush.bf16.msra.mxu2 %v504_v45  ;;  %v301_v14 = vlaneseq }
  0x12   :  { %87 = vmatpush.bf16.msra.mxu0 %v486_v4 }
  0x14   :  { %187 = vmatpush.bf16.msra.mxu1 %v494_v15  ;;  %286 = vmatpush.bf16.msra.mxu2 %v503_v46  ;;  %v302_v15 = vand.u32 127, %v301_v14 }
  0x16   :  { %88 = vmatpush.bf16.msra.mxu0 %v485_v5  ;;  %vm303_vm0 = vcmp.eq.s32.totalorder %v302_v15, 127 }
  0x18   :  { %188 = vmatpush.bf16.msra.mxu1 %v493_v16  ;;  %287 = vmatpush.bf16.msra.mxu2 %v502_v47 }
  0x1a   :  { %89 = vmatpush.bf16.msra.mxu0 %v484_v6 }
  0x1c   :  { %189 = vmatpush.bf16.msra.mxu1 %v492_v17  ;;  %288 = vmatpush.bf16.msra.mxu2 %v501_v48 }
  0x1e   :  { %90 = vmatpush.bf16.msra.mxu0 %v483_v7 }
  0x20   :  { %190 = vmatpush.bf16.msra.mxu1 %v491_v20  ;;  %289 = vmatpush.bf16.msra.mxu2 %v500_v49  ;;  %v511_v20 = vld [vmem:[%s668_s2 + $0x3] ss:$0 sm:$0xff] }
  0x21   :  { %91 = vmatmul.bf16.vlgmr.msra.gmra.mxu0 %v16_v10 }
  0x24   :  { %290 = vmatpush.bf16.msra.mxu2 %v499_v52 }
  0x9e   :  { %v92_v19 = vpop.f32.mrf.mxu0 }
  0x9f   :  { %v93_v21 = vadd.f32 %v507_v18, %v92_v19  ;;  %v510_v19 = vld [vmem:[%s668_s2 + $0x4] ss:$0 sm:$0xff] }
  0xa1   :  { %v99_v22 = vand.u32 2147483647, %v93_v21  ;;  %v97_v37 = vmax.f32 %v93_v21, 0.0 }
  0xa3   :  { %v101_v23 = vsub.f32 0.0, %v99_v22 }
  0xa5   :  { %v103_v24 = vmul.f32 1.442695, %v101_v23 }
  0xa6   :  { %v94_v25 = vpop.f32.mrf.mxu0 }
  0xa7   :  { %512 = vpow2.f32 %v103_v24  ;;  %v95_v26 = vadd.f32 %v507_v18, %v94_v25 }
  0xa9   :  { %v100_v27 = vand.u32 2147483647, %v95_v26  ;;  %v98_v38 = vmax.f32 %v95_v26, 0.0 }
  0xab   :  { %v102_v28 = vsub.f32 0.0, %v100_v27 }
  0xad   :  { %v513_v29 = vpop.eup %512  ;;  %v105_v30 = vmul.f32 1.442695, %v102_v28 }
  0xae   :  { %v107_v31 = vadd.f32 1.0, %v513_v29 }
  0xaf   :  { %514 = vpow2.f32 %v105_v30 }
  0xb0   :  { %516 = vlog2.f32 %v107_v31 }
  0xb5   :  { %v515_v32 = vpop.eup %514 }
  0xb6   :  { %v108_v33 = vadd.f32 1.0, %v515_v32  ;;  %v517_v34 = vpop.eup %516 }
  0xb7   :  { %v110_v35 = vmul.f32 0.6931472, %v517_v34 }
  0xb8   :  { %518 = vlog2.f32 %v108_v33 }
  0xb9   :  { %v113_v40 = vadd.f32 %v110_v35, %v97_v37 }
  0xbe   :  { %v519_v36 = vpop.eup %518 }
  0xbf   :  { %v112_v39 = vmul.f32 0.6931472, %v519_v36 }
  0xc1   :  { %v114_v41 = vadd.f32 %v112_v39, %v98_v38 }
  0xc3   :  { %v115_v42 = vpack.c.bf16 %v114_v41, %v113_v40 }
  0xc5   :  { %191 = vmatmul.bf16.vlgmr.msra.gmra.mxu1 %v115_v42 }
 0x142   :  { %v192_v51 = vpop.f32.mrf.mxu1 }
 0x143   :  { %v193_v53 = vadd.f32 %v508_v50, %v192_v51 }
 0x145   :  { %v199_v54 = vand.u32 2147483647, %v193_v53  ;;  %v197_v5 = vmax.f32 %v193_v53, 0.0 }
 0x147   :  { %v201_v55 = vsub.f32 0.0, %v199_v54 }
 0x149   :  { %v203_v56 = vmul.f32 1.442695, %v201_v55 }
 0x14a   :  { %v194_v57 = vpop.f32.mrf.mxu1 }
 0x14b   :  { %520 = vpow2.f32 %v203_v56  ;;  %v195_v58 = vadd.f32 %v508_v50, %v194_v57 }
 0x14d   :  { %v200_v59 = vand.u32 2147483647, %v195_v58  ;;  %v198_v6 = vmax.f32 %v195_v58, 0.0 }
 0x14f   :  { %v202_v60 = vsub.f32 0.0, %v200_v59 }
 0x151   :  { %v521_v61 = vpop.eup %520  ;;  %v205_v62 = vmul.f32 1.442695, %v202_v60 }
 0x152   :  { %v207_v63 = vadd.f32 1.0, %v521_v61 }
 0x153   :  { %522 = vpow2.f32 %v205_v62 }
 0x154   :  { %524 = vlog2.f32 %v207_v63 }
 0x159   :  { %v523_v0 = vpop.eup %522 }
 0x15a   :  { %v208_v1 = vadd.f32 1.0, %v523_v0  ;;  %v525_v2 = vpop.eup %524 }
 0x15b   :  { %v210_v3 = vmul.f32 0.6931472, %v525_v2 }
 0x15c   :  { %526 = vlog2.f32 %v208_v1 }
 0x15d   :  { %v213_v8 = vadd.f32 %v210_v3, %v197_v5 }
 0x162   :  { %v527_v4 = vpop.eup %526 }
 0x163   :  { %v212_v7 = vmul.f32 0.6931472, %v527_v4 }
 0x165   :  { %v214_v9 = vadd.f32 %v212_v7, %v198_v6 }
 0x167   :  { %v215_v10 = vpack.c.bf16 %v214_v9, %v213_v8 }
 0x169   :  { %291 = vmatmul.bf16.vlgmr.msra.gmra.mxu2 %v215_v10 }
 0x1ec   :  { %v292_v12 = vpop.f32.mrf.mxu2 }
 0x1ed   :  { %v293_v13 = vadd.f32 %v509_v11, %v292_v12 }
 0x1ef   :  { %528 = vtanh.f32 %v293_v13 }
 0x1f4   :  { %v294_v16 = vpop.f32.mrf.mxu2 }
 0x1f5   :  { %v529_v17 = vpop.eup %528  ;;  %v295_v18 = vadd.f32 %v509_v11, %v294_v16 }
 0x1f6   :  { %v299_v21 = vsub.f32 %v293_v13, %v529_v17 }
 0x1f7   :  { %530 = vtanh.f32 %v295_v18 }
 0x1f8   :  { %v304_v22 = vsel %vm303_vm0, 1.0, %v299_v21 }
 0x1f9   :  { %v316_v23 = vmul.f32 %v510_v19, %v304_v22  ;;  %v308_v24 = vmul.f32 %v511_v20, %v304_v22 }
 0x1fb   :  { %318 = vadd.xlane.f32.xlu1 %v316_v23  ;;  %310 = vadd.xlane.f32.xlu0 %v308_v24 }
 0x1fd   :  { %v531_v25 = vpop.eup %530 }
 0x1fe   :  { %v300_v26 = vsub.f32 %v295_v18, %v531_v25 }
 0x200   :  { %v305_v27 = vsel %vm303_vm0, 1.0, %v300_v26 }
 0x201   :  { %v317_v28 = vmul.f32 %v510_v19, %v305_v27  ;;  %v309_v29 = vmul.f32 %v511_v20, %v305_v27 }
 0x203   :  { %320 = vadd.xlane.f32.xlu1 %v317_v28  ;;  %312 = vadd.xlane.f32.xlu0 %v309_v29 }
 0x26e   :  { %v319_v30 = vpop.xlane.xlu1 %318  ;;  %v311_v31 = vpop.xlane.xlu0 %310 }
 0x26f   :  { %v332_v32 = vsub.f32 0.0, %v319_v30  ;;  %v322_v33 = vsub.f32 0.0, %v311_v31 }
 0x271   :  { %v334_v34 = vmul.f32 1.442695, %v332_v32  ;;  %v324_v35 = vmul.f32 1.442695, %v322_v33 }
 0x273   :  { %532 = vpow2.f32 %v334_v34 }
 0x274   :  { %534 = vpow2.f32 %v324_v35 }
 0x276   :  { %v321_v36 = vpop.xlane.xlu1 %320  ;;  %v313_v37 = vpop.xlane.xlu0 %312 }
 0x277   :  { %v333_v38 = vsub.f32 0.0, %v321_v36  ;;  %v323_v39 = vsub.f32 0.0, %v313_v37 }
 0x279   :  { %v533_v40 = vpop.eup %532  ;;  %v336_v41 = vmul.f32 1.442695, %v333_v38  ;;  %v326_v44 = vmul.f32 1.442695, %v323_v39 }
 0x27a   :  { %v535_v42 = vpop.eup %534  ;;  %v338_v43 = vadd.f32 1.0, %v533_v40 }
 0x27b   :  { %v328_v45 = vadd.f32 1.0, %v535_v42  ;;  %536 = vpow2.f32 %v336_v41 }
 0x27c   :  { %538 = vrcp.f32 %v338_v43 }
 0x27d   :  { %540 = vrcp.f32 %v328_v45 }
 0x27e   :  { %542 = vpow2.f32 %v326_v44 }
 0x281   :  { %v537_v46 = vpop.eup %536 }
 0x282   :  { %v539_v47 = vpop.eup %538  ;;  %v339_v48 = vadd.f32 1.0, %v537_v46 }
 0x283   :  { %v541_v49 = vpop.eup %540  ;;  %v344_v50 = vmul.f32 0.5, %v539_v47 }
 0x284   :  { %v543_v51 = vpop.eup %542  ;;  %v342_v52 = vmul.f32 0.5, %v541_v49  ;;  %544 = vrcp.f32 %v339_v48 }
 0x285   :  { %v329_v53 = vadd.f32 1.0, %v543_v51 }
 0x286   :  { %v346_v54 = vadd.f32 %v344_v50, %v342_v52 }
 0x287   :  { %546 = vrcp.f32 %v329_v53 }
 0x288   :  { %349 = vst.msk [vmem:[%s670_s3] sm:$0xff] %vm348_vm1, %v346_v54 }
 0x28a   :  { %v545_v55 = vpop.eup %544 }
 0x28b   :  { %v345_v56 = vmul.f32 0.5, %v545_v55 }
 0x28d   :  { %v547_v57 = vpop.eup %546 }
 0x28e   :  { %v343_v58 = vmul.f32 0.5, %v547_v57 }
 0x290   :  { %v347_v59 = vadd.f32 %v345_v56, %v343_v58 }
 0x292   :  { %350 = vst.msk [vmem:[%s670_s3 + $0x8] sm:$0xff] %vm348_vm1, %v347_v59 }

</bundles_post_ra>
